<compile_context>
chip_gen: v6e
topology: v6e:2x2x1
jax: 0.10.0
libtpu: 0.0.40
codegen_flags: <defaults>
</compile_context>

<pallas_src>
import jax
import jax.numpy as jnp
from jax.experimental import pallas as pl
from jax.experimental.pallas import tpu as pltpu


def _round_up(n, m):
    return ((n + m - 1) // m) * m


def _make_mlp_kernel(num_hidden, drop_p, apply_dropout):
    """Fused [Linear -> ReLU -> Dropout]*H -> Linear kernel body."""
    inv_keep = 1.0 / (1.0 - drop_p) if apply_dropout else 1.0

    def kernel(x_ref, *refs):
        # refs = (w0, b0, [mask0,] w1, b1, [mask1,] ..., w_out, b_out, out_ref)
        out_ref = refs[-1]
        params = refs[:-1]

        h = x_ref[...].astype(jnp.float32)
        idx = 0
        for _ in range(num_hidden):
            w = params[idx][...]        # bf16, lane-dense (K_pad, N_pad)
            b = params[idx + 1][...]    # f32, (1, N_pad)
            idx += 2
            # MXU: bf16 operands, f32 accumulation.
            acc = jnp.dot(h.astype(w.dtype), w,
                          preferred_element_type=jnp.float32)
            # Bias + ReLU in f32 on the VPU.
            h = jnp.maximum(acc + b, 0.0)
            if apply_dropout:
                u = params[idx][...]    # uniform [0,1) f32, same tile as h
                idx += 1
                # keep with prob (1 - drop_p), scale by 1/(1 - drop_p); single select.
                h = jnp.where(u >= jnp.float32(drop_p),
                              h * jnp.float32(inv_keep), 0.0)

        w_out = params[idx][...]
        b_out = params[idx + 1][...]
        out = jnp.dot(h.astype(w_out.dtype), w_out,
                      preferred_element_type=jnp.float32) + b_out
        out_ref[...] = out.astype(out_ref.dtype)

    return kernel


def prepare_params(weights, biases, out_weight, out_bias,
                   compute_dtype=jnp.bfloat16):
    """Pad every feature dim to a multiple of 128 and cast weights to the MXU
    dtype once (outside the per-call forward).  Biases stay f32, shaped (1, N)."""
    dims = [weights[0].shape[0]] + [w.shape[1] for w in weights] \
           + [out_weight.shape[1]]
    pdims = [_round_up(d, 128) for d in dims]

    all_w = list(weights) + [out_weight]
    all_b = list(biases) + [out_bias]
    ws, bs = [], []
    for li, (w, b) in enumerate(zip(all_w, all_b)):
        wi = jnp.zeros((pdims[li], pdims[li + 1]), compute_dtype)
        wi = wi.at[:w.shape[0], :w.shape[1]].set(w.astype(compute_dtype))
        bi = jnp.zeros((1, pdims[li + 1]), jnp.float32)
        bi = bi.at[0, :b.shape[0]].set(b.astype(jnp.float32))
        ws.append(wi)
        bs.append(bi)
    return {"weights": ws, "biases": bs, "dims": dims, "padded_dims": pdims}


def mlp_forward(x, params, *, drop_p=0.5, training=True, rng_key=None,
                tile_b=128):
    """Pallas forward pass of Network.forward.

    x       : (B, input_size) float array
    params  : output of prepare_params
    """
    ws, bs = params["weights"], params["biases"]
    dims, pdims = params["dims"], params["padded_dims"]
    num_hidden = len(ws) - 1
    apply_dropout = bool(training) and float(drop_p) > 0.0
    if apply_dropout:
        assert float(drop_p) < 1.0, "drop_p must be < 1.0"

    B = x.shape[0]
    in_pad, out_pad = pdims[0], pdims[-1]

    # Batch tiling: tile_b rows per grid step (>= 8 sublanes), batch padded up.
    tile_b = max(8, min(int(tile_b), _round_up(B, 8)))
    B_pad = _round_up(B, tile_b)
    grid = (B_pad // tile_b,)

    # Zero-pad the activations; padded rows/cols never reach the real outputs.
    x_p = jnp.zeros((B_pad, in_pad), jnp.float32)
    x_p = x_p.at[:B, :dims[0]].set(x.astype(jnp.float32))

    # Host-side dropout uniforms: one array per hidden layer, tiled with the batch.
    masks = []
    if apply_dropout:
        if rng_key is None:
            rng_key = jax.random.PRNGKey(0)
        keys = jax.random.split(rng_key, num_hidden)
        masks = [jax.random.uniform(keys[i], (B_pad, pdims[i + 1]), jnp.float32)
                 for i in range(num_hidden)]

    # Inputs: x, then per hidden layer (w, b[, mask]), then (w_out, b_out).
    inputs = [x_p]
    in_specs = [pl.BlockSpec((tile_b, in_pad), lambda i: (i, 0))]
    for li in range(num_hidden):
        inputs += [ws[li], bs[li]]
        in_specs += [
            pl.BlockSpec(ws[li].shape, lambda i: (0, 0)),   # VMEM-resident
            pl.BlockSpec(bs[li].shape, lambda i: (0, 0)),
        ]
        if apply_dropout:
            inputs.append(masks[li])
            in_specs.append(
                pl.BlockSpec((tile_b, pdims[li + 1]), lambda i: (i, 0)))
    inputs += [ws[-1], bs[-1]]
    in_specs += [pl.BlockSpec(ws[-1].shape, lambda i: (0, 0)),
                 pl.BlockSpec(bs[-1].shape, lambda i: (0, 0))]

    kernel = _make_mlp_kernel(num_hidden, float(drop_p), apply_dropout)

    # Explicit VMEM budget (v7x has 64 MiB/TC): resident params + 2x
    # double-buffered activation/mask/output tiles + f32 intermediates.
    param_bytes = sum(int(a.size) * a.dtype.itemsize for a in ws + bs)
    act_bytes = 4 * tile_b * (sum(pdims)
                              + (sum(pdims[1:-1]) if apply_dropout else 0))
    vmem_limit = int(min(100 * 2**20,
                         max(32 * 2**20, 2 * (param_bytes + 2 * act_bytes))))

    out = pl.pallas_call(
        kernel,
        out_shape=jax.ShapeDtypeStruct((B_pad, out_pad), jnp.float32),
        grid=grid,
        in_specs=in_specs,
        out_specs=pl.BlockSpec((tile_b, out_pad), lambda i: (i, 0)),
        compiler_params=pltpu.CompilerParams(
            dimension_semantics=("parallel",),
            vmem_limit_bytes=vmem_limit),
    )(*inputs)

    return out[:B, :dims[-1]]


def init_params(key, input_size, output_size, hidden_layers):
    """PyTorch nn.Linear-style init: U(-1/sqrt(fan_in), 1/sqrt(fan_in))."""
    sizes = [input_size] + list(hidden_layers)
    weights, biases = [], []
    for i in range(len(hidden_layers)):
        key, kw, kb = jax.random.split(key, 3)
        fan_in, fan_out = sizes[i], sizes[i + 1]
        bound = 1.0 / (fan_in ** 0.5)
        weights.append(jax.random.uniform(kw, (fan_in, fan_out), jnp.float32,
                                          -bound, bound))
        biases.append(jax.random.uniform(kb, (fan_out,), jnp.float32,
                                         -bound, bound))
    key, kw, kb = jax.random.split(key, 3)
    fan_in = hidden_layers[-1]
    bound = 1.0 / (fan_in ** 0.5)
    out_w = jax.random.uniform(kw, (fan_in, output_size), jnp.float32,
                               -bound, bound)
    out_b = jax.random.uniform(kb, (output_size,), jnp.float32, -bound, bound)
    return weights, biases, out_w, out_b


if __name__ == "__main__":
    # Small shapes consistent with the module: batch=8, in=32, hidden=[64,32], out=8.
    input_size, output_size = 32, 8
    hidden_layers = [64, 32]
    drop_p = 0.5
    batch = 8

    key = jax.random.PRNGKey(0)
    key, kx = jax.random.split(key)
    x = jax.random.normal(kx, (batch, input_size), jnp.float32)

    weights, biases, out_w, out_b = init_params(
        key, input_size, output_size, hidden_layers)
    params = prepare_params(weights, biases, out_w, out_b)

    # Training-mode forward (dropout active, deterministic host-side masks).
    key, kdrop = jax.random.split(key)
    out_train = mlp_forward(x, params, drop_p=drop_p, training=True,
                            rng_key=kdrop)
    jax.block_until_ready(out_train)
    assert out_train.shape == (batch, output_size)
    assert bool(jnp.all(jnp.isfinite(out_train)))

    # Eval-mode forward (dropout = identity), checked against a reference that
    # mirrors the kernel's bf16-operand / f32-accumulate matmuls.
    out_eval = mlp_forward(x, params, drop_p=drop_p, training=False)
    jax.block_until_ready(out_eval)

    h = x
    for w, b in zip(weights, biases):
        h = jnp.maximum(
            jnp.dot(h.astype(jnp.bfloat16), w.astype(jnp.bfloat16),
                    preferred_element_type=jnp.float32) + b, 0.0)
    ref = jnp.dot(h.astype(jnp.bfloat16), out_w.astype(jnp.bfloat16),
                  preferred_element_type=jnp.float32) + out_b

    assert out_eval.shape == (batch, output_size)
    assert jnp.allclose(out_eval, ref, atol=1e-2, rtol=1e-2), \
        float(jnp.max(jnp.abs(out_eval - ref)))

    print("KERNEL_OK")
</pallas_src>

<mosaic_0001>
module attributes {stable_mosaic.version = 11 : i64} {
  func.func @kernel(%arg0: i32, %arg1: memref<8x128xf32, #tpu.memory_space<vmem>>, %arg2: memref<128x128xbf16, #tpu.memory_space<vmem>>, %arg3: memref<1x128xf32, #tpu.memory_space<vmem>>, %arg4: memref<8x128xf32, #tpu.memory_space<vmem>>, %arg5: memref<128x128xbf16, #tpu.memory_space<vmem>>, %arg6: memref<1x128xf32, #tpu.memory_space<vmem>>, %arg7: memref<8x128xf32, #tpu.memory_space<vmem>>, %arg8: memref<128x128xbf16, #tpu.memory_space<vmem>>, %arg9: memref<1x128xf32, #tpu.memory_space<vmem>>, %arg10: memref<8x128xf32, #tpu.memory_space<vmem>>) attributes {dimension_semantics = [#tpu.dimension_semantics<parallel>], iteration_bounds = array<i64: 1>, scalar_prefetch = 0 : i64, scratch_operands = 0 : i64, tpu.core_type = #tpu.core_type<tc>, window_params = [{transform_indices = @transform_0, window_bounds = array<i64: 8, 128>}, {pipeline_mode = #tpu.pipeline_mode<synchronous>, transform_indices = @transform_1, window_bounds = array<i64: 128, 128>}, {pipeline_mode = #tpu.pipeline_mode<synchronous>, transform_indices = @transform_2, window_bounds = array<i64: 1, 128>}, {transform_indices = @transform_3, window_bounds = array<i64: 8, 128>}, {pipeline_mode = #tpu.pipeline_mode<synchronous>, transform_indices = @transform_4, window_bounds = array<i64: 128, 128>}, {pipeline_mode = #tpu.pipeline_mode<synchronous>, transform_indices = @transform_5, window_bounds = array<i64: 1, 128>}, {transform_indices = @transform_6, window_bounds = array<i64: 8, 128>}, {pipeline_mode = #tpu.pipeline_mode<synchronous>, transform_indices = @transform_7, window_bounds = array<i64: 128, 128>}, {pipeline_mode = #tpu.pipeline_mode<synchronous>, transform_indices = @transform_8, window_bounds = array<i64: 1, 128>}, {transform_indices = @transform_9, window_bounds = array<i64: 8, 128>}]} {
    %c0 = arith.constant 0 : index
    %c0_0 = arith.constant 0 : index
    %0 = vector.load %arg1[%c0, %c0_0] : memref<8x128xf32, #tpu.memory_space<vmem>>, vector<8x128xf32>
    %c0_1 = arith.constant 0 : index
    %c0_2 = arith.constant 0 : index
    %1 = vector.load %arg2[%c0_1, %c0_2] : memref<128x128xbf16, #tpu.memory_space<vmem>>, vector<128x128xbf16>
    %c0_3 = arith.constant 0 : index
    %c0_4 = arith.constant 0 : index
    %2 = vector.load %arg3[%c0_3, %c0_4] : memref<1x128xf32, #tpu.memory_space<vmem>>, vector<1x128xf32>
    %3 = arith.truncf %0 : vector<8x128xf32> to vector<8x128xbf16>
    %cst = arith.constant dense<0.000000e+00> : vector<8x128xf32>
    %4 = tpu.matmul %3, %1, %cst {dimension_numbers = #tpu.dot_dimension_numbers<[1], [0], [0], [1], [0, 0, 1, 1], [], []>} : vector<8x128xbf16>, vector<128x128xbf16>, vector<8x128xf32> -> vector<8x128xf32>
    %5 = vector.broadcast %2 : vector<1x128xf32> to vector<8x128xf32>
    %6 = arith.addf %4, %5 : vector<8x128xf32>
    %cst_5 = arith.constant 0.000000e+00 : f32
    %7 = vector.broadcast %cst_5 : f32 to vector<8x128xf32>
    %8 = arith.maximumf %6, %7 : vector<8x128xf32>
    %c0_6 = arith.constant 0 : index
    %c0_7 = arith.constant 0 : index
    %9 = vector.load %arg4[%c0_6, %c0_7] : memref<8x128xf32, #tpu.memory_space<vmem>>, vector<8x128xf32>
    %cst_8 = arith.constant 5.000000e-01 : f32
    %10 = vector.broadcast %cst_8 : f32 to vector<8x128xf32>
    %11 = arith.cmpf oge, %9, %10 : vector<8x128xf32>
    %cst_9 = arith.constant 2.000000e+00 : f32
    %12 = vector.broadcast %cst_9 : f32 to vector<8x128xf32>
    %13 = arith.mulf %8, %12 : vector<8x128xf32>
    %cst_10 = arith.constant 0.000000e+00 : f32
    %14 = vector.broadcast %cst_10 : f32 to vector<8x128xf32>
    %15 = arith.select %11, %13, %14 : vector<8x128xi1>, vector<8x128xf32>
    %c0_11 = arith.constant 0 : index
    %c0_12 = arith.constant 0 : index
    %16 = vector.load %arg5[%c0_11, %c0_12] : memref<128x128xbf16, #tpu.memory_space<vmem>>, vector<128x128xbf16>
    %c0_13 = arith.constant 0 : index
    %c0_14 = arith.constant 0 : index
    %17 = vector.load %arg6[%c0_13, %c0_14] : memref<1x128xf32, #tpu.memory_space<vmem>>, vector<1x128xf32>
    %18 = arith.truncf %15 : vector<8x128xf32> to vector<8x128xbf16>
    %cst_15 = arith.constant dense<0.000000e+00> : vector<8x128xf32>
    %19 = tpu.matmul %18, %16, %cst_15 {dimension_numbers = #tpu.dot_dimension_numbers<[1], [0], [0], [1], [0, 0, 1, 1], [], []>} : vector<8x128xbf16>, vector<128x128xbf16>, vector<8x128xf32> -> vector<8x128xf32>
    %20 = vector.broadcast %17 : vector<1x128xf32> to vector<8x128xf32>
    %21 = arith.addf %19, %20 : vector<8x128xf32>
    %cst_16 = arith.constant 0.000000e+00 : f32
    %22 = vector.broadcast %cst_16 : f32 to vector<8x128xf32>
    %23 = arith.maximumf %21, %22 : vector<8x128xf32>
    %c0_17 = arith.constant 0 : index
    %c0_18 = arith.constant 0 : index
    %24 = vector.load %arg7[%c0_17, %c0_18] : memref<8x128xf32, #tpu.memory_space<vmem>>, vector<8x128xf32>
    %cst_19 = arith.constant 5.000000e-01 : f32
    %25 = vector.broadcast %cst_19 : f32 to vector<8x128xf32>
    %26 = arith.cmpf oge, %24, %25 : vector<8x128xf32>
    %cst_20 = arith.constant 2.000000e+00 : f32
    %27 = vector.broadcast %cst_20 : f32 to vector<8x128xf32>
    %28 = arith.mulf %23, %27 : vector<8x128xf32>
    %cst_21 = arith.constant 0.000000e+00 : f32
    %29 = vector.broadcast %cst_21 : f32 to vector<8x128xf32>
    %30 = arith.select %26, %28, %29 : vector<8x128xi1>, vector<8x128xf32>
    %c0_22 = arith.constant 0 : index
    %c0_23 = arith.constant 0 : index
    %31 = vector.load %arg8[%c0_22, %c0_23] : memref<128x128xbf16, #tpu.memory_space<vmem>>, vector<128x128xbf16>
    %c0_24 = arith.constant 0 : index
    %c0_25 = arith.constant 0 : index
    %32 = vector.load %arg9[%c0_24, %c0_25] : memref<1x128xf32, #tpu.memory_space<vmem>>, vector<1x128xf32>
    %33 = arith.truncf %30 : vector<8x128xf32> to vector<8x128xbf16>
    %cst_26 = arith.constant dense<0.000000e+00> : vector<8x128xf32>
    %34 = tpu.matmul %33, %31, %cst_26 {dimension_numbers = #tpu.dot_dimension_numbers<[1], [0], [0], [1], [0, 0, 1, 1], [], []>} : vector<8x128xbf16>, vector<128x128xbf16>, vector<8x128xf32> -> vector<8x128xf32>
    %35 = vector.broadcast %32 : vector<1x128xf32> to vector<8x128xf32>
    %36 = arith.addf %34, %35 : vector<8x128xf32>
    %c0_27 = arith.constant 0 : index
    %c0_28 = arith.constant 0 : index
    %37 = vector.load %arg10[%c0_27, %c0_28] : memref<8x128xf32, #tpu.memory_space<vmem>>, vector<8x128xf32>
    tpu.vector_store %arg10[%c0_27, %c0_28], %36 {strides = array<i32>} : memref<8x128xf32, #tpu.memory_space<vmem>>, vector<8x128xf32>,
    return
  }
  func.func @transform_0(%arg0: i32) -> (i32, i32) {
    %c0_i32 = arith.constant 0 : i32
    %c0_i32_0 = arith.constant 0 : i32
    return %arg0, %c0_i32 : i32, i32
  }
  func.func @transform_1(%arg0: i32) -> (i32, i32) {
    %c0_i32 = arith.constant 0 : i32
    %c0_i32_0 = arith.constant 0 : i32
    %c0_i32_1 = arith.constant 0 : i32
    return %c0_i32, %c0_i32_0 : i32, i32
  }
  func.func @transform_2(%arg0: i32) -> (i32, i32) {
    %c0_i32 = arith.constant 0 : i32
    %c0_i32_0 = arith.constant 0 : i32
    %c0_i32_1 = arith.constant 0 : i32
    return %c0_i32, %c0_i32_0 : i32, i32
  }
  func.func @transform_3(%arg0: i32) -> (i32, i32) {
    %c0_i32 = arith.constant 0 : i32
    %c0_i32_0 = arith.constant 0 : i32
    return %arg0, %c0_i32 : i32, i32
  }
  func.func @transform_4(%arg0: i32) -> (i32, i32) {
    %c0_i32 = arith.constant 0 : i32
    %c0_i32_0 = arith.constant 0 : i32
    %c0_i32_1 = arith.constant 0 : i32
    return %c0_i32, %c0_i32_0 : i32, i32
  }
  func.func @transform_5(%arg0: i32) -> (i32, i32) {
    %c0_i32 = arith.constant 0 : i32
    %c0_i32_0 = arith.constant 0 : i32
    %c0_i32_1 = arith.constant 0 : i32
    return %c0_i32, %c0_i32_0 : i32, i32
  }
  func.func @transform_6(%arg0: i32) -> (i32, i32) {
    %c0_i32 = arith.constant 0 : i32
    %c0_i32_0 = arith.constant 0 : i32
    return %arg0, %c0_i32 : i32, i32
  }
  func.func @transform_7(%arg0: i32) -> (i32, i32) {
    %c0_i32 = arith.constant 0 : i32
    %c0_i32_0 = arith.constant 0 : i32
    %c0_i32_1 = arith.constant 0 : i32
    return %c0_i32, %c0_i32_0 : i32, i32
  }
  func.func @transform_8(%arg0: i32) -> (i32, i32) {
    %c0_i32 = arith.constant 0 : i32
    %c0_i32_0 = arith.constant 0 : i32
    %c0_i32_1 = arith.constant 0 : i32
    return %c0_i32, %c0_i32_0 : i32, i32
  }
  func.func @transform_9(%arg0: i32) -> (i32, i32) {
    %c0_i32 = arith.constant 0 : i32
    %c0_i32_0 = arith.constant 0 : i32
    return %arg0, %c0_i32 : i32, i32
  }
}

</mosaic_0001>

<bundles_post_ra>
// kernel: tpu_custom_call.1
= control target key start
LH: loop header
LB: loop body
LE: loop exit
PB: predicated region body
PF: predicated region fallthrough
CT: control target
= control target key end

     0   :  { %14 = vsyncpa [#allocation3], 0  ;;  %s874_s0 = inlined_call_operand.hbm [shape: f32[8,128], index: 0, kind: input, shape index: {}]   ;;  %s875_s1 = inlined_call_operand.hbm [shape: bf16[128,128], index: 1, kind: input, shape index: {}]   ;;  %s876_s2 = inlined_call_operand.vmem [shape: f32[1,128], index: 2, kind: input, shape index: {}]   ;;  %s877_s3 = inlined_call_operand.hbm [shape: f32[8,128], index: 3, kind: input, shape index: {}]   ;;  %s878_s4 = inlined_call_operand.hbm [shape: bf16[128,128], index: 4, kind: input, shape index: {}]   ;;  %s879_s5 = inlined_call_operand.vmem [shape: f32[1,128], index: 5, kind: input, shape index: {}]   ;;  %s880_s6 = inlined_call_operand.vmem [shape: f32[8,128], index: 6, kind: input, shape index: {}]   ;;  %s881_s7 = inlined_call_operand.hbm [shape: bf16[128,128], index: 7, kind: input, shape index: {}]   ;;  %s882_s8 = inlined_call_operand.vmem [shape: f32[1,128], index: 8, kind: input, shape index: {}]   ;;  %s883_s9 = inlined_call_operand.hbm [shape: f32[8,128], index: 9, kind: output, shape index: {}]  }
   0x1   :  { %15 = vsyncpa [#allocation6], 0 }
   0x2   :  { %16 = vsyncpa [#allocation9], 0 }
   0x3   :  { %17 = vsyncpa [#allocation4], 0  ;;  %s745_s30 = smov [#allocation5]  }
   0x4   :  { %s33_s10 = sshll.u32 %s745_s30, 4  ;;  %s34_s10 = int_to_ptr.vmem [resolvable:$true] %s33_s10 }
   0x5   :  { %s625_s11 = scalar_lea.vmem %s34_s10, 1024  ;;  %p630_p1 = scmp.lt.s32.totalorder %s34_s10, %s34_s10 }
   0x6   :  { %p626_p0 = scmp.ne.s32.totalorder %s34_s10, %s625_s11  ;;  %p631_p2 = scmp.lt.s32.totalorder %s625_s11, %s625_s11 }
   0x8   :  { %p632_p3 = por %p631_p2, %p630_p1 }
   0xa   :  { %p633_p4 = pnand %p632_p3, %p626_p0 }
   0xc   :  { %636 = shalt.err (!%p633_p4)
}
   0xd   :  { %s746_s12 = smov 64   ;;  %s747_s13 = smov 4  }
   0xe   :  { %39 = dma.hbm_to_vmem [thread:$0]  %s875_s1, 1024, %s34_s10, [#allocation6], %s746_s12, %s746_s12, %s747_s13  }
   0xf   :  { %s748_s16 = smov [#allocation8]   ;;  %s749_s18 = smov [#allocation2]  }
  0x10   :  { %s57_s17 = sshll.u32 %s748_s16, 4  ;;  %s24_s19 = sshll.u32 %s749_s18, 4  ;;  %s58_s17 = int_to_ptr.vmem [resolvable:$true] %s57_s17  ;;  %s25_s19 = int_to_ptr.vmem [resolvable:$true] %s24_s19 }
  0x11   :  { %s645_s20 = scalar_lea.vmem %s58_s17, 1024  ;;  %p650_p6 = scmp.lt.s32.totalorder %s58_s17, %s58_s17 }
  0x12   :  { %p646_p5 = scmp.ne.s32.totalorder %s58_s17, %s645_s20  ;;  %p651_p7 = scmp.lt.s32.totalorder %s645_s20, %s645_s20 }
  0x14   :  { %p652_p8 = por %p651_p7, %p650_p6 }
  0x16   :  { %p653_p9 = pnand %p652_p8, %p646_p5 }
  0x18   :  { %656 = shalt.err (!%p653_p9)
}
  0x19   :  { %63 = dma.hbm_to_vmem [thread:$0]  %s878_s4, 1024, %s58_s17, [#allocation9], %s746_s12, %s746_s12, %s747_s13  }
  0x1a   :  { %s665_s1 = scalar_lea.vmem %s25_s19, 128  ;;  %p670_p11 = scmp.lt.s32.totalorder %s25_s19, %s25_s19 }
  0x1b   :  { %p666_p10 = scmp.ne.s32.totalorder %s25_s19, %s665_s1  ;;  %p671_p12 = scmp.lt.s32.totalorder %s665_s1, %s665_s1 }
  0x1d   :  { %p672_p13 = por %p671_p12, %p670_p11 }
  0x1f   :  { %p673_p0 = pnand %p672_p13, %p666_p10 }
  0x21   :  { %676 = shalt.err (!%p673_p0)
}
  0x22   :  { %27 = dma.hbm_to_vmem [thread:$0]  %s874_s0, 128, %s25_s19, [#allocation3]  }
  0x23   :  { %s750_s25 = smov [#allocation7]   ;;  %s751_s27 = smov [#allocation10]  }
  0x24   :  { %s48_s26 = sshll.u32 %s750_s25, 4  ;;  %s73_s28 = sshll.u32 %s751_s27, 4  ;;  %s49_s26 = int_to_ptr.vmem [resolvable:$true] %s48_s26  ;;  %s74_s28 = int_to_ptr.vmem [resolvable:$true] %s73_s28 }
  0x25   :  { %s685_s29 = scalar_lea.vmem %s49_s26, 128  ;;  %p690_p2 = scmp.lt.s32.totalorder %s49_s26, %s49_s26 }
  0x26   :  { %p686_p1 = scmp.ne.s32.totalorder %s49_s26, %s685_s29  ;;  %p691_p3 = scmp.lt.s32.totalorder %s685_s29, %s685_s29 }
  0x28   :  { %p692_p4 = por %p691_p3, %p690_p2 }
  0x2a   :  { %p693_p5 = pnand %p692_p4, %p686_p1 }
  0x2c   :  { %696 = shalt.err (!%p693_p5)
}
  0x2d   :  { %51 = dma.hbm_to_vmem [thread:$0]  %s877_s3, 128, %s49_s26, [#allocation6]  }
  0x2e   :  { %s705_s10 = scalar_lea.vmem %s74_s28, 1024  ;;  %p710_p7 = scmp.lt.s32.totalorder %s74_s28, %s74_s28 }
  0x2f   :  { %p706_p6 = scmp.ne.s32.totalorder %s74_s28, %s705_s10  ;;  %p711_p8 = scmp.lt.s32.totalorder %s705_s10, %s705_s10 }
  0x31   :  { %p712_p9 = por %p711_p8, %p710_p7 }
  0x33   :  { %p713_p10 = pnand %p712_p9, %p706_p6 }
  0x35   :  { %716 = shalt.err (!%p713_p10)
}
  0x36   :  { %79 = dma.hbm_to_vmem [thread:$0]  %s881_s7, 1024, %s74_s28, [#allocation9], %s746_s12, %s746_s12, %s747_s13  }
  0x37   :  { %737 = dma.done.wait [#allocation3], 128  }
  0x38   :  { %738 = vsyncadd [#allocation3], 4294967168 }
  0x39   :  { %739 = dma.done.wait [#allocation6], 1152  }
  0x3a   :  { %740 = vsyncadd [#allocation6], 4294966144 }
  0x3b   :  { %741 = dma.done.wait [#allocation9], 2048  }
  0x3c   :  { %742 = vsyncadd [#allocation9], 4294965248  ;;  %v752_v0 = vmov 0.0   ;;  %vm753_vm0 = vmmov 0   ;;  %v593_v1 = vld [vmem:[#allocation5 + $0x38] sm:$0xff]   ;;  %v594_v2 = vld [vmem:[#allocation5 + $0x30] sm:$0xff]  }
  0x3d   :  { %523 = vmatprep.subr.bf16.mxu0 %v752_v0  ;;  %539 = vmatprep.mubr.msk.bf16.mxu0 %vm753_vm0, %v752_v0  ;;  %v595_v3 = vld [vmem:[#allocation5 + $0x28] sm:$0xff]   ;;  %v601_v4 = vld [vmem:[#allocation8 + $0x38] sm:$0xff]   ;;  %v602_v6 = vld [vmem:[#allocation8 + $0x30] sm:$0xff]  }
  0x3e   :  { %543 = vmatprep.subr.bf16.mxu1 %v752_v0  ;;  %559 = vmatprep.mubr.msk.bf16.mxu1 %vm753_vm0, %v752_v0  ;;  %v596_v5 = vld [vmem:[#allocation5 + $0x20] sm:$0xff]   ;;  %v597_v7 = vld [vmem:[#allocation5 + $0x18] sm:$0xff]   ;;  %v603_v8 = vld [vmem:[#allocation8 + $0x28] sm:$0xff]  }
  0x3f   :  { %524 = vmatpush3.bf16.msra.mxu0 %v593_v1  ;;  %544 = vmatpush3.bf16.msra.mxu1 %v601_v4  ;;  %v598_v9 = vld [vmem:[#allocation5 + $0x10] sm:$0xff]   ;;  %v604_v10 = vld [vmem:[#allocation8 + $0x20] sm:$0xff]   ;;  %v605_v12 = vld [vmem:[#allocation8 + $0x18] sm:$0xff]  }
  0x40   :  { %525 = vmatprep.subr.bf16.mxu0 %v752_v0  ;;  %545 = vmatprep.subr.bf16.mxu1 %v752_v0  ;;  %v599_v11 = vld [vmem:[#allocation5 + $0x8] sm:$0xff]   ;;  %v600_v13 = vld [vmem:[#allocation5] sm:$0xff]   ;;  %v98_v14 = vld [vmem:[#allocation2] sm:$0xff] }
  0x41   :  { %v606_v15 = vld [vmem:[#allocation8 + $0x10] sm:$0xff]   ;;  %v116_v16 = vpack.c.bf16 %v98_v14, %v98_v14  ;;  %v607_v17 = vld [vmem:[#allocation8 + $0x8] sm:$0xff]   ;;  %v608_v18 = vld [vmem:[#allocation8] sm:$0xff]  }
  0x42   :  { %v609_v19 = vld [vmem:[#allocation10 + $0x38] sm:$0xff]   ;;  %v610_v20 = vld [vmem:[#allocation10 + $0x30] sm:$0xff]   ;;  %v611_v21 = vld [vmem:[#allocation10 + $0x28] sm:$0xff]  }
  0x43   :  { %526 = vmatpush3.bf16.msra.mxu0 %v594_v2  ;;  %546 = vmatpush3.bf16.msra.mxu1 %v602_v6  ;;  %v612_v22 = vld [vmem:[#allocation10 + $0x20] sm:$0xff]   ;;  %v613_v23 = vld [vmem:[#allocation10 + $0x18] sm:$0xff]   ;;  %v614_v24 = vld [vmem:[#allocation10 + $0x10] sm:$0xff]  }
  0x44   :  { %527 = vmatprep.subr.bf16.mxu0 %v752_v0  ;;  %547 = vmatprep.subr.bf16.mxu1 %v752_v0  ;;  %v463_v25 = vld [vmem:[%s876_s2] ss:$0 sm:$0xff]  ;;  %v212_v27 = vld [vmem:[#allocation7] sm:$0xff]  ;;  %v615_v35 = vld [vmem:[#allocation10 + $0x8] sm:$0xff]  }
  0x45   :  { %vm213_vm1 = vcmp.ge.f32.partialorder %v212_v27, 0.5  ;;  %v616_v36 = vld [vmem:[#allocation10] sm:$0xff]   ;;  %v472_v37 = vld [vmem:[%s879_s5] ss:$0 sm:$0xff]  ;;  %s754_s5 = smov [#allocation11]  }
  0x46   :  { %vm481_vm2 = vmpackc.low %vm213_vm1, %vm213_vm1  ;;  %v329_v39 = vld [vmem:[%s880_s6] sm:$0xff]  ;;  %s452_s17 = sshll.u32 %s754_s5, 4  ;;  %s453_s17 = int_to_ptr.vmem [resolvable:$true] %s452_s17 }
  0x47   :  { %528 = vmatpush3.bf16.msra.mxu0 %v595_v3  ;;  %548 = vmatpush3.bf16.msra.mxu1 %v603_v8  ;;  %vm330_vm3 = vcmp.ge.f32.partialorder %v329_v39, 0.5  ;;  %v484_v47 = vld [vmem:[%s882_s8] ss:$0 sm:$0xff]  ;;  %s717_s6 = scalar_lea.vmem %s453_s17, 128  ;;  %p722_p12 = scmp.lt.s32.totalorder %s453_s17, %s453_s17 }
  0x48   :  { %529 = vmatprep.subr.bf16.mxu0 %v752_v0  ;;  %549 = vmatprep.subr.bf16.mxu1 %v752_v0  ;;  %vm493_vm4 = vmpackc.low %vm330_vm3, %vm330_vm3  ;;  %p718_p11 = scmp.ne.s32.totalorder %s453_s17, %s717_s6  ;;  %p723_p13 = scmp.lt.s32.totalorder %s717_s6, %s717_s6 }
  0x4a   :  { %p724_p0 = por %p723_p13, %p722_p12 }
  0x4b   :  { %530 = vmatpush3.bf16.msra.mxu0 %v596_v5  ;;  %550 = vmatpush3.bf16.msra.mxu1 %v604_v10 }
  0x4c   :  { %531 = vmatprep.subr.bf16.mxu0 %v752_v0  ;;  %551 = vmatprep.subr.bf16.mxu1 %v752_v0  ;;  %p725_p1 = pnand %p724_p0, %p718_p11 }
  0x4f   :  { %532 = vmatpush3.bf16.msra.mxu0 %v597_v7  ;;  %552 = vmatpush3.bf16.msra.mxu1 %v605_v12 }
  0x50   :  { %533 = vmatprep.subr.bf16.mxu0 %v752_v0  ;;  %553 = vmatprep.subr.bf16.mxu1 %v752_v0 }
  0x53   :  { %534 = vmatpush3.bf16.msra.mxu0 %v598_v9  ;;  %554 = vmatpush3.bf16.msra.mxu1 %v606_v15 }
  0x54   :  { %535 = vmatprep.subr.bf16.mxu0 %v752_v0  ;;  %555 = vmatprep.subr.bf16.mxu1 %v752_v0 }
  0x57   :  { %536 = vmatpush3.bf16.msra.mxu0 %v599_v11  ;;  %556 = vmatpush3.bf16.msra.mxu1 %v607_v17 }
  0x58   :  { %537 = vmatprep.subr.bf16.mxu0 %v752_v0  ;;  %557 = vmatprep.subr.bf16.mxu1 %v752_v0 }
  0x5b   :  { %538 = vmatpush3.bf16.msra.mxu0 %v600_v13  ;;  %558 = vmatpush3.bf16.msra.mxu1 %v608_v18 }
  0x5c   :  { %563 = vmatprep.subr.bf16.mxu0 %v752_v0 }
  0x5e   :  { %540 = vmatmul.mubr.bf16.vlgmr.msra.gmra.mxu0 %v116_v16 }
  0x5f   :  { %579 = vmatprep.mubr.msk.bf16.mxu0 %vm753_vm0, %v752_v0  ;;  %564 = vmatpush3.bf16.msra.mxu0 %v609_v19 }
  0x60   :  { %565 = vmatprep.subr.bf16.mxu0 %v752_v0 }
  0x63   :  { %566 = vmatpush3.bf16.msra.mxu0 %v610_v20 }
  0x64   :  { %567 = vmatprep.subr.bf16.mxu0 %v752_v0 }
  0x67   :  { %568 = vmatpush3.bf16.msra.mxu0 %v611_v21 }
  0x68   :  { %569 = vmatprep.subr.bf16.mxu0 %v752_v0 }
  0x6b   :  { %570 = vmatpush3.bf16.msra.mxu0 %v612_v22 }
  0x6c   :  { %571 = vmatprep.subr.bf16.mxu0 %v752_v0 }
  0x6f   :  { %572 = vmatpush3.bf16.msra.mxu0 %v613_v23 }
  0x70   :  { %573 = vmatprep.subr.bf16.mxu0 %v752_v0 }
  0x73   :  { %574 = vmatpush3.bf16.msra.mxu0 %v614_v24 }
  0x74   :  { %575 = vmatprep.subr.bf16.mxu0 %v752_v0 }
  0x77   :  { %576 = vmatpush3.bf16.msra.mxu0 %v615_v35 }
  0x78   :  { %577 = vmatprep.subr.bf16.mxu0 %v752_v0 }
  0x7b   :  { %578 = vmatpush3.bf16.msra.mxu0 %v616_v36 }
 0x11e   :  { %v205_v26 = vpop.f32.mrf.mxu0 }
 0x11f   :  { %v206_v28 = vadd.f32 %v463_v25, %v205_v26 }
 0x120   :  { %v541_v29 = vpop.f32.mrf.mxu0 }
 0x121   :  { %v211_v30 = vmax.f32 %v206_v28, 0.0 }
 0x122   :  { %v208_v31 = vpop.f32.mrf.mxu0 }
 0x123   :  { %v214_v32 = vmul.f32 2.0, %v211_v30 }
 0x124   :  { %v542_v33 = vpop.f32.mrf.mxu0 }
 0x125   :  { %v482_v34 = vpack.c.bf16 %v214_v32, %v214_v32 }
 0x127   :  { %560 = vmatmul.mubr.msk.bf16.vlgmr.msra.gmra.mxu1 %vm481_vm2, %v482_v34 }
 0x1e7   :  { %v322_v38 = vpop.f32.mrf.mxu1 }
 0x1e8   :  { %v323_v40 = vadd.f32 %v472_v37, %v322_v38 }
 0x1e9   :  { %v561_v41 = vpop.f32.mrf.mxu1 }
 0x1ea   :  { %v328_v42 = vmax.f32 %v323_v40, 0.0 }
 0x1eb   :  { %v325_v43 = vpop.f32.mrf.mxu1 }
 0x1ec   :  { %v331_v44 = vmul.f32 2.0, %v328_v42 }
 0x1ed   :  { %v562_v45 = vpop.f32.mrf.mxu1 }
 0x1ee   :  { %v494_v46 = vpack.c.bf16 %v331_v44, %v331_v44 }
 0x1f0   :  { %580 = vmatmul.mubr.msk.bf16.vlgmr.msra.gmra.mxu0 %vm493_vm4, %v494_v46 }
 0x2b0   :  { %v439_v48 = vpop.f32.mrf.mxu0 }
 0x2b1   :  { %v440_v49 = vadd.f32 %v484_v47, %v439_v48 }
 0x2b2   :  { %v581_v50 = vpop.f32.mrf.mxu0 }
 0x2b3   :  { %445 = vst [vmem:[#allocation11] sm:$0xff] %v440_v49 }
 0x2b4   :  { %v442_v51 = vpop.f32.mrf.mxu0 }
 0x2b5   :  { %728 = shalt.err (!%p725_p1)
}
 0x2b6   :  { %455 = dma.vmem_to_hbm [thread:$0]  %s453_s17, 128, %s883_s9, [#allocation4]   ;;  %v582_v52 = vpop.f32.mrf.mxu0 }
 0x2b7   :  { %743 = dma.done.wait [#allocation4], 128  }
 0x2b8   :  { %744 = vsyncadd [#allocation4], 4294967168 }
 0x2b9   :  { %459 = vsyncpa [#allocation3], 1 }
 0x2ba   :  { %460 = vsyncpa [#allocation6], 1 }
 0x2bb   :  { %461 = vsyncpa [#allocation9], 1 }
 0x2bc   :  { %462 = vsyncpa [#allocation4], 1 }

</bundles_post_ra>
